<compile_context>
chip_gen: v5e
topology: v5e:2x2
jax: 0.10.0
libtpu: 0.0.40
codegen_flags: <defaults>
</compile_context>

<pallas_src>
import functools

import jax
import jax.numpy as jnp
from jax.experimental import pallas as pl
from jax.experimental.pallas import tpu as pltpu


def _pick_tile(n, target=256):
    """Use `target` if it divides n, otherwise fall back to the full extent."""
    if n >= target and n % target == 0:
        return target
    return n


# ---------------------------------------------------------------------------
# 1) QKV projection:  x (B, N, D) @ W_qkv^T (D, 3D)  ->  qkv3 (3, B, N, D)
#    One full-width matmul per (batch, n-tile); weight is VMEM-resident.
# ---------------------------------------------------------------------------
def _qkv_proj_kernel(x_ref, w_ref, qkv_ref):
    # x_ref:   (1, tn, D)    bf16
    # w_ref:   (D, 3D)       bf16   (resident; Q columns pre-scaled)
    # qkv_ref: (3, 1, tn, D) bf16
    d = x_ref.shape[2]
    acc = jnp.dot(x_ref[0], w_ref[...],
                  preferred_element_type=jnp.float32)          # (tn, 3D) f32
    for c in range(3):                                          # q, k, v slabs
        qkv_ref[c, 0] = acc[:, c * d:(c + 1) * d].astype(qkv_ref.dtype)


# ---------------------------------------------------------------------------
# 2) Flash attention + head merge + output projection + bias.
#    Grid (B, q-tiles, kv-tiles); heads are a static in-kernel loop.
# ---------------------------------------------------------------------------
def _flash_proj_kernel(q_ref, k_ref, v_ref, wp_ref, b_ref, o_ref,
                       m_sc, l_sc, acc_sc, *, num_heads, head_dim):
    ki = pl.program_id(2)

    @pl.when(ki == 0)
    def _():
        m_sc[...] = jnp.full_like(m_sc, -jnp.inf)
        l_sc[...] = jnp.zeros_like(l_sc)
        acc_sc[...] = jnp.zeros_like(acc_sc)

    q = q_ref[0, 0]            # (tq, D) bf16  (scale already folded into W_q)
    k = k_ref[0, 0]            # (tk, D) bf16
    v = v_ref[0, 0]            # (tk, D) bf16

    # Per-head online softmax; heads unrolled (static), m/l/acc kept in f32.
    for h in range(num_heads):
        lo, hi = h * head_dim, (h + 1) * head_dim
        qh = q[:, lo:hi]                                   # (tq, Dh)
        kh = k[:, lo:hi]                                   # (tk, Dh)
        vh = v[:, lo:hi]                                   # (tk, Dh)

        # q_h @ k_h^T without materializing a transpose (contract Dh of both).
        s = jax.lax.dot_general(qh, kh, (((1,), (1,)), ((), ())),
                                preferred_element_type=jnp.float32)  # (tq, tk)

        m_prev = m_sc[h]                                   # (tq, 1)
        m_new = jnp.maximum(m_prev, jnp.max(s, axis=-1, keepdims=True))
        alpha = jnp.exp(m_prev - m_new)                    # (tq, 1)
        p = jnp.exp(s - m_new)                             # (tq, tk)
        l_sc[h] = alpha * l_sc[h] + jnp.sum(p, axis=-1, keepdims=True)
        acc_sc[h] = alpha * acc_sc[h] + jnp.dot(
            p.astype(vh.dtype), vh, preferred_element_type=jnp.float32)
        m_sc[h] = m_new

    # Epilogue: normalize, merge heads through W_proj^T, add bias, store a
    # lane-dense (tq, D) output tile. No HBM intermediate, no third kernel.
    @pl.when(ki == pl.num_programs(2) - 1)
    def _():
        tq = q.shape[0]
        d_out = wp_ref.shape[1]
        acc_out = jnp.zeros((tq, d_out), jnp.float32)
        for h in range(num_heads):
            lo, hi = h * head_dim, (h + 1) * head_dim
            inv_l = pl.reciprocal(l_sc[h], approx=True)     # EUP slot, ~free
            oh = (acc_sc[h] * inv_l).astype(jnp.bfloat16)   # (tq, Dh)
            wh = wp_ref[lo:hi, :]                           # (Dh, D) resident
            acc_out = acc_out + jnp.dot(oh, wh,
                                        preferred_element_type=jnp.float32)
        o_ref[0] = (acc_out + b_ref[...]).astype(o_ref.dtype)


def attention_forward(x, w_qkv, w_proj, b_proj, num_heads):
    """x: (B, N, D); w_qkv: (3D, D) torch-layout; w_proj: (D, D); b_proj: (D,)."""
    B, N, D = x.shape
    H = num_heads
    Dh = D // H
    scale = Dh ** (-0.5)

    # One-time weight repack + bf16 cast (done at load time in a real model).
    # Fold the softmax scale into the Q columns *before* the bf16 cast.
    w_qkv_t = jnp.transpose(w_qkv).astype(jnp.float32)           # (D, 3D)
    col_scale = jnp.concatenate([jnp.full((D,), scale, jnp.float32),
                                 jnp.ones((2 * D,), jnp.float32)])
    w_qkv_t = (w_qkv_t * col_scale[None, :]).astype(jnp.bfloat16)  # (D, 3D)
    w_proj_t = jnp.transpose(w_proj).astype(jnp.bfloat16)          # (D, D)
    b_proj2 = b_proj.reshape(1, D).astype(jnp.float32)

    x_bf = x.astype(jnp.bfloat16)

    tn = _pick_tile(N, 256)   # sequence tile for the QKV projection
    tq = _pick_tile(N, 256)   # query tile
    tk = _pick_tile(N, 256)   # key/value tile

    # TODO(synk): for ViT-L/H (D >= 1024) pass an explicit vmem_limit_bytes
    # and re-check tile sizes against v7x's 64 MiB physical VMEM.

    # ---- 1) QKV projection (lane-dense (3, B, N, D) output) -----------------
    qkv3 = pl.pallas_call(
        _qkv_proj_kernel,
        out_shape=jax.ShapeDtypeStruct((3, B, N, D), jnp.bfloat16),
        grid=(B, N // tn),
        in_specs=[
            pl.BlockSpec((1, tn, D), lambda b, ni: (b, ni, 0)),
            pl.BlockSpec((D, 3 * D), lambda b, ni: (0, 0)),   # resident weight
        ],
        out_specs=pl.BlockSpec((3, 1, tn, D), lambda b, ni: (0, b, ni, 0)),
        compiler_params=pltpu.CompilerParams(
            dimension_semantics=("parallel", "parallel")),
    )(x_bf, w_qkv_t)

    # ---- 2) flash attention + head merge + output projection + bias ---------
    out = pl.pallas_call(
        functools.partial(_flash_proj_kernel, num_heads=H, head_dim=Dh),
        out_shape=jax.ShapeDtypeStruct((B, N, D), x.dtype),
        grid=(B, N // tq, N // tk),
        in_specs=[
            pl.BlockSpec((1, 1, tq, D), lambda b, qi, ki: (0, b, qi, 0)),  # q
            pl.BlockSpec((1, 1, tk, D), lambda b, qi, ki: (1, b, ki, 0)),  # k
            pl.BlockSpec((1, 1, tk, D), lambda b, qi, ki: (2, b, ki, 0)),  # v
            pl.BlockSpec((D, D), lambda b, qi, ki: (0, 0)),    # resident W_proj^T
            pl.BlockSpec((1, D), lambda b, qi, ki: (0, 0)),    # resident bias
        ],
        out_specs=pl.BlockSpec((1, tq, D), lambda b, qi, ki: (b, qi, 0)),
        scratch_shapes=[
            pltpu.VMEM((H, tq, 1), jnp.float32),    # running max m (per head)
            pltpu.VMEM((H, tq, 1), jnp.float32),    # running denom l (per head)
            pltpu.VMEM((H, tq, Dh), jnp.float32),   # PV accumulator (per head)
        ],
        compiler_params=pltpu.CompilerParams(
            dimension_semantics=("parallel", "parallel", "arbitrary")),
    )(qkv3, qkv3, qkv3, w_proj_t, b_proj2)

    return out


def attention_reference(x, w_qkv, w_proj, b_proj, num_heads):
    """Pure-JAX (f32) reference mirroring the PyTorch forward."""
    B, N, D = x.shape
    head_dim = D // num_heads
    scale = head_dim ** (-0.5)
    qkv = x @ w_qkv.T                                           # (B, N, 3D)
    qkv = qkv.reshape(B, N, 3, num_heads, head_dim)             # (qkv h d) split
    q = jnp.transpose(qkv[:, :, 0], (0, 2, 1, 3))               # (B, H, N, Dh)
    k = jnp.transpose(qkv[:, :, 1], (0, 2, 1, 3))
    v = jnp.transpose(qkv[:, :, 2], (0, 2, 1, 3))
    dots = jnp.einsum('bhnd,bhmd->bhnm', q, k) * scale
    attn = jax.nn.softmax(dots, axis=-1)
    out = jnp.einsum('bhnm,bhmd->bhnd', attn, v)
    out = jnp.transpose(out, (0, 2, 1, 3)).reshape(B, N, D)     # b n (h d)
    return out @ w_proj.T + b_proj


if __name__ == "__main__":
    # Small shapes consistent with the module (dim divisible by num_heads),
    # large enough to exercise multi-tile flash attention (2 q-tiles, 2 kv-tiles).
    B, N, D = 2, 512, 64
    num_heads = 4          # head_dim = 16

    key = jax.random.PRNGKey(0)
    kx, kq, kp, kb = jax.random.split(key, 4)
    x = jax.random.normal(kx, (B, N, D), dtype=jnp.float32)
    # PyTorch parameter shapes: qkv.weight (3D, D) [qkv_bias=False],
    # proj.weight (D, D), proj.bias (D,)
    w_qkv = jax.random.normal(kq, (3 * D, D), dtype=jnp.float32) * 0.05
    w_proj = jax.random.normal(kp, (D, D), dtype=jnp.float32) * 0.05
    b_proj = jax.random.normal(kb, (D,), dtype=jnp.float32) * 0.05

    out = attention_forward(x, w_qkv, w_proj, b_proj, num_heads)
    out = jax.block_until_ready(out)

    ref = attention_reference(x, w_qkv, w_proj, b_proj, num_heads)
    assert out.shape == (B, N, D)
    # bf16 MXU operands + approx reciprocal => relaxed tolerance vs f32 ref.
    assert jnp.allclose(out.astype(jnp.float32), ref, atol=2e-2, rtol=2e-2), \
        "mismatch vs reference"
    print("KERNEL_OK")
</pallas_src>

<mosaic_0001>
module attributes {stable_mosaic.version = 11 : i64} {
  func.func @_qkv_proj_kernel(%arg0: i32, %arg1: i32, %arg2: memref<1x256x64xbf16, #tpu.memory_space<vmem>>, %arg3: memref<64x192xbf16, #tpu.memory_space<vmem>>, %arg4: memref<3x1x256x64xbf16, #tpu.memory_space<vmem>>) attributes {dimension_semantics = [#tpu.dimension_semantics<parallel>, #tpu.dimension_semantics<parallel>], iteration_bounds = array<i64: 2, 2>, scalar_prefetch = 0 : i64, scratch_operands = 0 : i64, tpu.core_type = #tpu.core_type<tc>, window_params = [{transform_indices = @transform_0, window_bounds = array<i64: 1, 256, 64>}, {pipeline_mode = #tpu.pipeline_mode<synchronous>, transform_indices = @transform_1, window_bounds = array<i64: 64, 192>}, {transform_indices = @transform_2, window_bounds = array<i64: 3, 1, 256, 64>}]} {
    %c0 = arith.constant 0 : index
    %c0_0 = arith.constant 0 : index
    %c0_1 = arith.constant 0 : index
    %0 = vector.load %arg2[%c0, %c0_0, %c0_1] : memref<1x256x64xbf16, #tpu.memory_space<vmem>>, vector<1x256x64xbf16>
    %1 = vector.shape_cast %0 : vector<1x256x64xbf16> to vector<256x64xbf16>
    %c0_2 = arith.constant 0 : index
    %c0_3 = arith.constant 0 : index
    %2 = vector.load %arg3[%c0_2, %c0_3] : memref<64x192xbf16, #tpu.memory_space<vmem>>, vector<64x192xbf16>
    %cst = arith.constant dense<0.000000e+00> : vector<256x192xf32>
    %3 = tpu.matmul %1, %2, %cst {dimension_numbers = #tpu.dot_dimension_numbers<[1], [0], [0], [1], [0, 0, 1, 1], [], []>} : vector<256x64xbf16>, vector<64x192xbf16>, vector<256x192xf32> -> vector<256x192xf32>
    %4 = vector.extract_strided_slice %3 {offsets = [0, 0], sizes = [256, 64], strides = [1, 1]} : vector<256x192xf32> to vector<256x64xf32>
    %5 = arith.truncf %4 : vector<256x64xf32> to vector<256x64xbf16>
    %c0_4 = arith.constant 0 : index
    %c0_5 = arith.constant 0 : index
    %c0_6 = arith.constant 0 : index
    %c0_7 = arith.constant 0 : index
    %6 = vector.load %arg4[%c0_4, %c0_5, %c0_6, %c0_7] : memref<3x1x256x64xbf16, #tpu.memory_space<vmem>>, vector<1x1x256x64xbf16>
    %7 = vector.shape_cast %6 : vector<1x1x256x64xbf16> to vector<256x64xbf16>
    %8 = vector.shape_cast %5 : vector<256x64xbf16> to vector<1x1x256x64xbf16>
    tpu.vector_store %arg4[%c0_4, %c0_5, %c0_6, %c0_7], %8 {strides = array<i32>} : memref<3x1x256x64xbf16, #tpu.memory_space<vmem>>, vector<1x1x256x64xbf16>,
    %9 = vector.extract_strided_slice %3 {offsets = [0, 64], sizes = [256, 64], strides = [1, 1]} : vector<256x192xf32> to vector<256x64xf32>
    %10 = arith.truncf %9 : vector<256x64xf32> to vector<256x64xbf16>
    %c1 = arith.constant 1 : index
    %c0_8 = arith.constant 0 : index
    %c0_9 = arith.constant 0 : index
    %c0_10 = arith.constant 0 : index
    %11 = vector.load %arg4[%c1, %c0_8, %c0_9, %c0_10] : memref<3x1x256x64xbf16, #tpu.memory_space<vmem>>, vector<1x1x256x64xbf16>
    %12 = vector.shape_cast %11 : vector<1x1x256x64xbf16> to vector<256x64xbf16>
    %13 = vector.shape_cast %10 : vector<256x64xbf16> to vector<1x1x256x64xbf16>
    tpu.vector_store %arg4[%c1, %c0_8, %c0_9, %c0_10], %13 {strides = array<i32>} : memref<3x1x256x64xbf16, #tpu.memory_space<vmem>>, vector<1x1x256x64xbf16>,
    %14 = vector.extract_strided_slice %3 {offsets = [0, 128], sizes = [256, 64], strides = [1, 1]} : vector<256x192xf32> to vector<256x64xf32>
    %15 = arith.truncf %14 : vector<256x64xf32> to vector<256x64xbf16>
    %c2 = arith.constant 2 : index
    %c0_11 = arith.constant 0 : index
    %c0_12 = arith.constant 0 : index
    %c0_13 = arith.constant 0 : index
    %16 = vector.load %arg4[%c2, %c0_11, %c0_12, %c0_13] : memref<3x1x256x64xbf16, #tpu.memory_space<vmem>>, vector<1x1x256x64xbf16>
    %17 = vector.shape_cast %16 : vector<1x1x256x64xbf16> to vector<256x64xbf16>
    %18 = vector.shape_cast %15 : vector<256x64xbf16> to vector<1x1x256x64xbf16>
    tpu.vector_store %arg4[%c2, %c0_11, %c0_12, %c0_13], %18 {strides = array<i32>} : memref<3x1x256x64xbf16, #tpu.memory_space<vmem>>, vector<1x1x256x64xbf16>,
    return
  }
  func.func @transform_0(%arg0: i32, %arg1: i32) -> (i32, i32, i32) {
    %c0_i32 = arith.constant 0 : i32
    %c0_i32_0 = arith.constant 0 : i32
    return %arg0, %arg1, %c0_i32 : i32, i32, i32
  }
  func.func @transform_1(%arg0: i32, %arg1: i32) -> (i32, i32) {
    %c0_i32 = arith.constant 0 : i32
    %c0_i32_0 = arith.constant 0 : i32
    %c0_i32_1 = arith.constant 0 : i32
    return %c0_i32, %c0_i32_0 : i32, i32
  }
  func.func @transform_2(%arg0: i32, %arg1: i32) -> (i32, i32, i32, i32) {
    %c0_i32 = arith.constant 0 : i32
    %c0_i32_0 = arith.constant 0 : i32
    %c0_i32_1 = arith.constant 0 : i32
    return %c0_i32, %arg0, %arg1, %c0_i32_0 : i32, i32, i32, i32
  }
}

</mosaic_0001>

<bundles_post_ra>
// kernel: tpu_custom_call.1
= control target key start
LH: loop header
LB: loop body
LE: loop exit
PB: predicated region body
PF: predicated region fallthrough
CT: control target
= control target key end

     0   :  { %s1719_s9 = smov 0   ;;  %s1721_s10 = smov 0   ;;  %s2255_s0 = inlined_call_operand.vmem [shape: bf16[2,512,64], index: 0, kind: input, shape index: {}]   ;;  %s2256_s1 = inlined_call_operand.vmem [shape: bf16[64,192], index: 1, kind: input, shape index: {}]   ;;  %s2257_s2 = inlined_call_operand.vmem [shape: bf16[3,2,512,64], index: 2, kind: output, shape index: {}]  }
   0x1   :  { %s1723_s11 = smov 0   ;;  %s1725_s12 = smov 0  }
   0x2   :  { %s1727_s13 = smov 0   ;;  %s1729_s14 = smov 0  }
   0x3   :  { %s1731_s15 = smov 0  }
   0x4 LB: > { %s21_s16 = sadd.s32 1, %s1693_s13  ;;  %s24_s17 = sadd.s32 1, %s1697_s14  ;;  %s1701_s15 = sphi %s1731_s15, %s12_s15   ;;  %s1697_s14 = sphi %s1729_s14, %s2264_s14   ;;  %s1693_s13 = sphi %s1727_s13, %s2263_s13   ;;  %s1689_s12 = sphi %s1725_s12, %s2262_s12   ;;  %s1685_s11 = sphi %s1723_s11, %s2261_s11   ;;  %s1681_s10 = sphi %s1721_s10, %s2260_s10   ;;  %s1677_s9 = sphi %s1719_s9, %s2259_s9  }
   0x5   : > { %p22_p0 = scmp.ge.s32.totalorder %s21_s16, 2  ;;  %s1352_s18 = sadd.s32 4294967295, %s1701_s15  }
   0x6   : > { %p92_p1 = scmp.ne.s32.totalorder %s1681_s10, %s1677_s9  ;;  %p93_p2 = scmp.eq.s32.totalorder %s1352_s18, 3 }
   0x7   : > { %s2266_s16 = smov (%p22_p0, %s21_s16), 0  ;;  %s2268_s17 = smov (!%p22_p0, %s24_s17), %s1697_s14 }
   0x8   : > { %s78_s19 = ssub.s32 %s1693_s13, %s2266_s16  ;;  %p26_p3 = scmp.ge.s32.totalorder %s2268_s17, 2 }
   0x9   : > { %p1356_p4 = scmp.ge.s32.totalorder %s1701_s15, 1  ;;  %p1765_p5 = por %p93_p2, %p92_p1 }
   0xa   : > { %p133_p6 = scmp.lt.s32.totalorder %s1701_s15, 5  ;;  %s2270_s17 = smov (%p26_p3, %s2268_s17), 0 }
   0xb   : > { %s77_s21 = ssub.s32 %s1697_s14, %s2270_s17  ;;  %s82_s23 = sadd.s32 1, %s1681_s10 }
   0xc   : > { %p134_p7 = pnand %p1356_p4, %p133_p6  ;;  %s79_s22 = sor.u32 %s78_s19, %s77_s21 }
   0xd   : > { %p80_p8 = scmp.eq.s32.totalorder %s79_s22, 0  ;;  %s1791_s5 = sshll.u32 (!%p134_p7), %s1685_s11, 5 }
   0xe   : > { %137 = sbr.rel (%p134_p7) target bundleno = 417 (0x1a1), region = 28  ;;  %p159_p9 = scmp.lt.s32.totalorder (!%p134_p7), %s1689_s12, 1 }
   0xf   : > { %s1776_s24 = scalar_select %p80_p8, %s1681_s10, %s82_s23  }
  0x10   : > { %p161_p10 = scmp.lt.s32.totalorder (!%p134_p7), %s1791_s5, 63  ;;  %s155_s4 = sand.u32 (!%p134_p7), 1, %s1677_s9  }
  0x11   : > { %s1589_s6 = smul.u32 (!%p134_p7), 384, %s155_s4  ;;  %s1703_s7 = smov (!%p134_p7), 64  }
  0x13   : > { %v1450_v0 = vld [vmem:[%s2256_s1 + $0x30] sm:$0xf]  ;;  %v1580_v1 = vld [vmem:[%s2256_s1 + $0x34] sm:$0xf0]  ;;  %v1442_v2 = vld [vmem:[%s2256_s1 + $0x20] sm:$0xf] }
  0x14   : > { %v1451_v3 = vor.u32 %v1580_v1, %v1450_v0  ;;  %v1578_v4 = vld [vmem:[%s2256_s1 + $0x24] sm:$0xf0]  ;;  %v1434_v6 = vld [vmem:[%s2256_s1 + $0x10] sm:$0xf]  ;;  %v1576_v7 = vld [vmem:[%s2256_s1 + $0x14] sm:$0xf0] }
  0x15   : > { %v1443_v5 = vor.u32 %v1578_v4, %v1442_v2  ;;  %s160_s19 = scalar_select %p159_p9, %s1689_s12, 1  ;;  %v1435_v8 = vor.u32 %v1576_v7, %v1434_v6  ;;  %v1426_v9 = vld [vmem:[%s2256_s1] sm:$0xf]  ;;  %v1574_v10 = vld [vmem:[%s2256_s1 + $0x4] sm:$0xf0]  ;;  %vm330_vm0 = vcmask 523264  }
  0x16   : > { %383 = vmatpush.bf16.msra.mxu0 %v1451_v3  ;;  %1581 = vmatpush.bf16.msra.mxu2 %v1451_v3  ;;  %s162_s21 = scalar_select %p161_p10, %s1791_s5, 63  ;;  %v1427_v11 = vor.u32 %v1574_v10, %v1426_v9  ;;  %v1579_v20 = vld [vmem:[%s2256_s1 + $0x34] sm:$0xf]  ;;  %v1452_v21 = vld [vmem:[%s2256_s1 + $0x38] sm:$0xf0]  ;;  %vm589_vm1 = vcmask 519168  }
  0x17   : > { %s1358_s22 = sshll.u32 %s160_s19, 6  ;;  %v1455_v22 = vor.u32 %v1579_v20, %v1452_v21  ;;  %v1577_v25 = vld [vmem:[%s2256_s1 + $0x24] sm:$0xf]  ;;  %v1444_v26 = vld [vmem:[%s2256_s1 + $0x28] sm:$0xf0]  ;;  %s1553_s9 = sshll.u32 (%p1765_p5), %s1689_s12, 6 }
  0x18   : > { %s164_s11 = sadd.s32 %s1358_s22, %s162_s21  ;;  %v1447_v27 = vor.u32 %v1577_v25, %v1444_v26  ;;  %v1575_v28 = vld [vmem:[%s2256_s1 + $0x14] sm:$0xf]  ;;  %v1436_v29 = vld [vmem:[%s2256_s1 + $0x18] sm:$0xf0]  ;;  %v1573_v31 = vld [vmem:[%s2256_s1 + $0x4] sm:$0xf]  ;;  %s857_s8 = sadd.s32 (%p1765_p5), %s1553_s9, %s1791_s5 }
  0x19   : > { %s1359_s28 = sshll.u32 %s164_s11, 2  ;;  %1585 = vmatpush.bf16.msra.mxu3 %v1455_v22  ;;  %472 = vmatpush.bf16.msra.mxu1 %v1455_v22  ;;  %v1439_v30 = vor.u32 %v1575_v28, %v1436_v29  ;;  %v1428_v32 = vld [vmem:[%s2256_s1 + $0x8] sm:$0xf0]  ;;  %s1554_s18 = sshll.u32 (%p1765_p5), %s857_s8, 2 }
  0x1a   : > { %384 = vmatpush.bf16.msra.mxu0 %v1443_v5  ;;  %1582 = vmatpush.bf16.msra.mxu2 %v1443_v5  ;;  %s1812_s3 = scalar_lea.vmem %s2255_s0, %s1359_s28  ;;  %v1431_v33 = vor.u32 %v1573_v31, %v1428_v32  ;;  %s2138_s20 = scalar_lea.vmem (%p1765_p5), %s2257_s2, %s1554_s18 }
  0x1b   : > { %v1557_v12 = vld [vmem:[%s1812_s3] sm:$0xff]  ;;  %v1558_v14 = vld [vmem:[%s1812_s3 + $0x8] sm:$0xff]  ;;  %v1559_v16 = vld [vmem:[%s1812_s3 + $0x10] sm:$0xff] }
  0x1c   : > { %v1565_v13 = vld [vmem:[%s1812_s3 + $0x40] sm:$0xff]  ;;  %v1566_v15 = vld [vmem:[%s1812_s3 + $0x48] sm:$0xff]  ;;  %v1567_v17 = vld [vmem:[%s1812_s3 + $0x50] sm:$0xff] }
  0x1d   : > { %v1560_v18 = vld [vmem:[%s1812_s3 + $0x18] sm:$0xff]  ;;  %v1561_v23 = vld [vmem:[%s1812_s3 + $0x20] sm:$0xff]  ;;  %1586 = vmatpush.bf16.msra.mxu3 %v1447_v27  ;;  %473 = vmatpush.bf16.msra.mxu1 %v1447_v27  ;;  %v1562_v34 = vld [vmem:[%s1812_s3 + $0x28] sm:$0xff] }
  0x1e   : > { %385 = vmatpush.bf16.msra.mxu0 %v1435_v8  ;;  %1583 = vmatpush.bf16.msra.mxu2 %v1435_v8  ;;  %v1568_v19 = vld [vmem:[%s1812_s3 + $0x58] sm:$0xff]  ;;  %v1569_v24 = vld [vmem:[%s1812_s3 + $0x60] sm:$0xff]  ;;  %v1570_v35 = vld [vmem:[%s1812_s3 + $0x68] sm:$0xff] }
  0x1f   : > { %v1865_v36 = vld [vmem:[%s1812_s3 + $0x30] sm:$0xff]  ;;  %v1877_v38 = vld [vmem:[%s1812_s3 + $0x38] sm:$0xff] }
  0x20   : > { %v1868_v37 = vld [vmem:[%s1812_s3 + $0x70] sm:$0xff]  ;;  %v1880_v39 = vld [vmem:[%s1812_s3 + $0x78] sm:$0xff]  ;;  %s1891_s3 = scalar_lea.vmem [#allocation2], %s1589_s6 }
  0x21   : > { %1587 = vmatpush.bf16.msra.mxu3 %v1439_v30  ;;  %474 = vmatpush.bf16.msra.mxu1 %v1439_v30 }
  0x22   : > { %386 = vmatpush.bf16.msra.mxu0 %v1427_v11  ;;  %1584 = vmatpush.bf16.msra.mxu2 %v1427_v11 }
  0x25   : > { %1456 = vmatmul.msk.bf16.vlgmr.msra.gmra.mxu0 %vm330_vm0, %v1557_v12  ;;  %1464 = vmatmul.msk.bf16.vlgmr.msra.gmra.mxu2 %vm330_vm0, %v1565_v13 }
  0x26   : > { %1588 = vmatpush.bf16.msra.mxu3 %v1431_v33  ;;  %475 = vmatpush.bf16.msra.mxu1 %v1431_v33 }
  0x29   : > { %1480 = vmatmul.msk.bf16.vlgmr.msra.gmra.mxu3 %vm330_vm0, %v1565_v13  ;;  %1472 = vmatmul.msk.bf16.vlgmr.msra.gmra.mxu1 %vm330_vm0, %v1557_v12 }
  0x35   : > { %1457 = vmatmul.msk.bf16.gmra.mxu0 %vm330_vm0, %v1558_v14  ;;  %1465 = vmatmul.msk.bf16.gmra.mxu2 %vm330_vm0, %v1566_v15 }
  0x39   : > { %1481 = vmatmul.msk.bf16.gmra.mxu3 %vm330_vm0, %v1566_v15  ;;  %1473 = vmatmul.msk.bf16.gmra.mxu1 %vm330_vm0, %v1558_v14 }
  0x45   : > { %1458 = vmatmul.msk.bf16.gmra.mxu0 %vm330_vm0, %v1559_v16  ;;  %1466 = vmatmul.msk.bf16.gmra.mxu2 %vm330_vm0, %v1567_v17 }
  0x49   : > { %1482 = vmatmul.msk.bf16.gmra.mxu3 %vm330_vm0, %v1567_v17  ;;  %1474 = vmatmul.msk.bf16.gmra.mxu1 %vm330_vm0, %v1559_v16 }
  0x55   : > { %1459 = vmatmul.msk.bf16.gmra.mxu0 %vm330_vm0, %v1560_v18  ;;  %1467 = vmatmul.msk.bf16.gmra.mxu2 %vm330_vm0, %v1568_v19 }
  0x59   : > { %1483 = vmatmul.msk.bf16.gmra.mxu3 %vm330_vm0, %v1568_v19  ;;  %1475 = vmatmul.msk.bf16.gmra.mxu1 %vm330_vm0, %v1560_v18 }
  0x65   : > { %1460 = vmatmul.msk.bf16.gmra.mxu0 %vm330_vm0, %v1561_v23  ;;  %1468 = vmatmul.msk.bf16.gmra.mxu2 %vm330_vm0, %v1569_v24 }
  0x69   : > { %1484 = vmatmul.msk.bf16.gmra.mxu3 %vm330_vm0, %v1569_v24  ;;  %1476 = vmatmul.msk.bf16.gmra.mxu1 %vm330_vm0, %v1561_v23 }
  0x75   : > { %1461 = vmatmul.msk.bf16.gmra.mxu0 %vm330_vm0, %v1562_v34  ;;  %1469 = vmatmul.msk.bf16.gmra.mxu2 %vm330_vm0, %v1570_v35 }
  0x79   : > { %1485 = vmatmul.msk.bf16.gmra.mxu3 %vm330_vm0, %v1570_v35  ;;  %1477 = vmatmul.msk.bf16.gmra.mxu1 %vm330_vm0, %v1562_v34 }
  0x85   : > { %1462 = vmatmul.msk.bf16.gmra.mxu0 %vm330_vm0, %v1865_v36  ;;  %1470 = vmatmul.msk.bf16.gmra.mxu2 %vm330_vm0, %v1868_v37 }
  0x89   : > { %1486 = vmatmul.msk.bf16.gmra.mxu3 %vm330_vm0, %v1868_v37  ;;  %1478 = vmatmul.msk.bf16.gmra.mxu1 %vm330_vm0, %v1865_v36 }
  0x95   : > { %1463 = vmatmul.msk.bf16.gmra.mxu0 %vm330_vm0, %v1877_v38  ;;  %1471 = vmatmul.msk.bf16.gmra.mxu2 %vm330_vm0, %v1880_v39 }
  0x99   : > { %1487 = vmatmul.msk.bf16.gmra.mxu3 %vm330_vm0, %v1880_v39  ;;  %1479 = vmatmul.msk.bf16.gmra.mxu1 %vm330_vm0, %v1877_v38 }
  0xa2   : > { %v388_v40 = vpop.f32.mrf.mxu0 }
  0xa3   : > { %v557_v41 = vpack.c.bf16 %v388_v40, %v388_v40 }
  0xa5   : > { %590 = vst.msk [vmem:[%s1891_s3] sm:$0xf] %vm589_vm1, %v557_v41  ;;  %654 = vrot.lane.b32.xlu0 %v557_v41, %s1703_s7 }
  0xa6   : > { %v477_v18 = vpop.f32.mrf.mxu1 }
  0xa7   : > { %v783_v20 = vpack.c.bf16 %v477_v18, %v477_v18 }
  0xa8   : > { %v428_v42 = vpop.f32.mrf.mxu2 }
  0xa9   : > { %v573_v43 = vpack.c.bf16 %v428_v42, %v428_v42  ;;  %1520 = vst.msk [vmem:[%s1891_s3 + $0x100] sm:$0xf] %vm589_vm1, %v783_v20 }
  0xaa   : > { %v390_v44 = vpop.f32.mrf.mxu0 }
  0xab   : > { %606 = vst.msk [vmem:[%s1891_s3 + $0x40] sm:$0xf] %vm589_vm1, %v573_v43  ;;  %v558_v45 = vpack.c.bf16 %v390_v44, %v390_v44  ;;  %686 = vrot.lane.b32.xlu1 %v573_v43, %s1703_s7 }
  0xac   : > { %v517_v19 = vpop.f32.mrf.mxu3 }
  0xad   : > { %591 = vst.msk [vmem:[%s1891_s3 + $0x4] sm:$0xf] %vm589_vm1, %v558_v45  ;;  %656 = vrot.lane.b32.xlu0 %v558_v45, %s1703_s7  ;;  %v799_v21 = vpack.c.bf16 %v517_v19, %v517_v19 }
  0xae   : > { %v479_v26 = vpop.f32.mrf.mxu1 }
  0xaf   : > { %1536 = vst.msk [vmem:[%s1891_s3 + $0x140] sm:$0xf] %vm589_vm1, %v799_v21  ;;  %v784_v28 = vpack.c.bf16 %v479_v26, %v479_v26 }
  0xb0   : > { %v430_v46 = vpop.f32.mrf.mxu2 }
  0xb1   : > { %v574_v47 = vpack.c.bf16 %v430_v46, %v430_v46  ;;  %1521 = vst.msk [vmem:[%s1891_s3 + $0x104] sm:$0xf] %vm589_vm1, %v784_v28 }
  0xb2   : > { %v393_v48 = vpop.f32.mrf.mxu0 }
  0xb3   : > { %607 = vst.msk [vmem:[%s1891_s3 + $0x44] sm:$0xf] %vm589_vm1, %v574_v47  ;;  %v559_v49 = vpack.c.bf16 %v393_v48, %v393_v48  ;;  %688 = vrot.lane.b32.xlu2 %v574_v47, %s1703_s7 }
  0xb4   : > { %v519_v27 = vpop.f32.mrf.mxu3 }
  0xb5   : > { %592 = vst.msk [vmem:[%s1891_s3 + $0x8] sm:$0xf] %vm589_vm1, %v559_v49  ;;  %658 = vrot.lane.b32.xlu1 %v559_v49, %s1703_s7  ;;  %v800_v29 = vpack.c.bf16 %v519_v27, %v519_v27 }
  0xb6   : > { %v482_v34 = vpop.f32.mrf.mxu1 }
  0xb7   : > { %1537 = vst.msk [vmem:[%s1891_s3 + $0x144] sm:$0xf] %vm589_vm1, %v800_v29  ;;  %v785_v36 = vpack.c.bf16 %v482_v34, %v482_v34 }
  0xb8   : > { %v433_v50 = vpop.f32.mrf.mxu2 }
  0xb9   : > { %v575_v51 = vpack.c.bf16 %v433_v50, %v433_v50  ;;  %1522 = vst.msk [vmem:[%s1891_s3 + $0x108] sm:$0xf] %vm589_vm1, %v785_v36 }
  0xba   : > { %v395_v52 = vpop.f32.mrf.mxu0 }
  0xbb   : > { %608 = vst.msk [vmem:[%s1891_s3 + $0x48] sm:$0xf] %vm589_vm1, %v575_v51  ;;  %v560_v53 = vpack.c.bf16 %v395_v52, %v395_v52  ;;  %690 = vrot.lane.b32.xlu0 %v575_v51, %s1703_s7 }
  0xbc   : > { %v522_v35 = vpop.f32.mrf.mxu3 }
  0xbd   : > { %593 = vst.msk [vmem:[%s1891_s3 + $0xc] sm:$0xf] %vm589_vm1, %v560_v53  ;;  %660 = vrot.lane.b32.xlu1 %v560_v53, %s1703_s7  ;;  %v801_v37 = vpack.c.bf16 %v522_v35, %v522_v35 }
  0xbe   : > { %v484_v43 = vpop.f32.mrf.mxu1 }
  0xbf   : > { %1538 = vst.msk [vmem:[%s1891_s3 + $0x148] sm:$0xf] %vm589_vm1, %v801_v37  ;;  %v786_v44 = vpack.c.bf16 %v484_v43, %v484_v43 }
  0xc0   : > { %v435_v54 = vpop.f32.mrf.mxu2 }
  0xc1   : > { %v576_v55 = vpack.c.bf16 %v435_v54, %v435_v54  ;;  %1523 = vst.msk [vmem:[%s1891_s3 + $0x10c] sm:$0xf] %vm589_vm1, %v786_v44 }
  0xc2   : > { %v398_v56 = vpop.f32.mrf.mxu0 }
  0xc3   : > { %609 = vst.msk [vmem:[%s1891_s3 + $0x4c] sm:$0xf] %vm589_vm1, %v576_v55  ;;  %v561_v57 = vpack.c.bf16 %v398_v56, %v398_v56 }
  0xc4   : > { %v524_v45 = vpop.f32.mrf.mxu3 }
  0xc5   : > { %594 = vst.msk [vmem:[%s1891_s3 + $0x10] sm:$0xf] %vm589_vm1, %v561_v57  ;;  %692 = vrot.lane.b32.xlu1 %v576_v55, %s1703_s7  ;;  %662 = vrot.lane.b32.xlu2 %v561_v57, %s1703_s7  ;;  %v802_v46 = vpack.c.bf16 %v524_v45, %v524_v45 }
  0xc6   : > { %v487_v51 = vpop.f32.mrf.mxu1 }
  0xc7   : > { %1539 = vst.msk [vmem:[%s1891_s3 + $0x14c] sm:$0xf] %vm589_vm1, %v802_v46  ;;  %v787_v52 = vpack.c.bf16 %v487_v51, %v487_v51 }
  0xc8   : > { %v438_v58 = vpop.f32.mrf.mxu2 }
  0xc9   : > { %v577_v59 = vpack.c.bf16 %v438_v58, %v438_v58  ;;  %1524 = vst.msk [vmem:[%s1891_s3 + $0x110] sm:$0xf] %vm589_vm1, %v787_v52 }
  0xca   : > { %v400_v60 = vpop.f32.mrf.mxu0 }
  0xcb   : > { %610 = vst.msk [vmem:[%s1891_s3 + $0x50] sm:$0xf] %vm589_vm1, %v577_v59  ;;  %v562_v61 = vpack.c.bf16 %v400_v60, %v400_v60 }
  0xcc   : > { %v527_v53 = vpop.f32.mrf.mxu3 }
  0xcd   : > { %595 = vst.msk [vmem:[%s1891_s3 + $0x14] sm:$0xf] %vm589_vm1, %v562_v61  ;;  %694 = vrot.lane.b32.xlu2 %v577_v59, %s1703_s7  ;;  %v803_v55 = vpack.c.bf16 %v527_v53, %v527_v53 }
  0xcf   : > { %1540 = vst.msk [vmem:[%s1891_s3 + $0x150] sm:$0xf] %vm589_vm1, %v803_v55 }
  0xd0   : > { %v440_v62 = vpop.f32.mrf.mxu2 }
  0xd1   : > { %v578_v63 = vpack.c.bf16 %v440_v62, %v440_v62 }
  0xd2   : > { %v403_v0 = vpop.f32.mrf.mxu0 }
  0xd3   : > { %611 = vst.msk [vmem:[%s1891_s3 + $0x54] sm:$0xf] %vm589_vm1, %v578_v63  ;;  %v563_v1 = vpack.c.bf16 %v403_v0, %v403_v0  ;;  %696 = vrot.lane.b32.xlu0 %v578_v63, %s1703_s7 }
  0xd4   : > { %v529_v63 = vpop.f32.mrf.mxu3 }
  0xd5   : > { %596 = vst.msk [vmem:[%s1891_s3 + $0x18] sm:$0xf] %vm589_vm1, %v563_v1  ;;  %664 = vrot.lane.b32.xlu2 %v562_v61, %s1703_s7  ;;  %v489_v61 = vpop.f32.mrf.mxu1 }
  0xd6   : > { %v788_v62 = vpack.c.bf16 %v489_v61, %v489_v61 }
  0xd8   : > { %v443_v2 = vpop.f32.mrf.mxu2  ;;  %1525 = vst.msk [vmem:[%s1891_s3 + $0x114] sm:$0xf] %vm589_vm1, %v788_v62 }
  0xd9   : > { %v579_v3 = vpack.c.bf16 %v443_v2, %v443_v2 }
  0xda   : > { %v405_v4 = vpop.f32.mrf.mxu0 }
  0xdb   : > { %612 = vst.msk [vmem:[%s1891_s3 + $0x58] sm:$0xf] %vm589_vm1, %v579_v3  ;;  %v564_v5 = vpack.c.bf16 %v405_v4, %v405_v4  ;;  %698 = vrot.lane.b32.xlu1 %v579_v3, %s1703_s7  ;;  %666 = vrot.lane.b32.xlu0 %v563_v1, %s1703_s7  ;;  %v804_v3 = vpack.c.bf16 %v529_v63, %v529_v63 }
  0xdd   : > { %597 = vst.msk [vmem:[%s1891_s3 + $0x1c] sm:$0xf] %vm589_vm1, %v564_v5 }
  0xde   : > { %1541 = vst.msk [vmem:[%s1891_s3 + $0x154] sm:$0xf] %vm589_vm1, %v804_v3 }
  0xe0   : > { %v445_v6 = vpop.f32.mrf.mxu2 }
  0xe1   : > { %v580_v7 = vpack.c.bf16 %v445_v6, %v445_v6 }
  0xe2   : > { %v408_v8 = vpop.f32.mrf.mxu0 }
  0xe3   : > { %613 = vst.msk [vmem:[%s1891_s3 + $0x5c] sm:$0xf] %vm589_vm1, %v580_v7  ;;  %v565_v9 = vpack.c.bf16 %v408_v8, %v408_v8  ;;  %700 = vrot.lane.b32.xlu2 %v580_v7, %s1703_s7  ;;  %668 = vrot.lane.b32.xlu1 %v564_v5, %s1703_s7  ;;  %v492_v5 = vpop.f32.mrf.mxu1  ;;  %v532_v7 = vpop.f32.mrf.mxu3 }
  0xe4   : > { %v789_v6 = vpack.c.bf16 %v492_v5, %v492_v5 }
  0xe5   : > { %598 = vst.msk [vmem:[%s1891_s3 + $0x20] sm:$0xf] %vm589_vm1, %v565_v9 }
  0xe6   : > { %1526 = vst.msk [vmem:[%s1891_s3 + $0x118] sm:$0xf] %vm589_vm1, %v789_v6 }
  0xe8   : > { %v448_v10 = vpop.f32.mrf.mxu2 }
  0xe9   : > { %v581_v11 = vpack.c.bf16 %v448_v10, %v448_v10  ;;  %v805_v10 = vpack.c.bf16 %v532_v7, %v532_v7 }
  0xea   : > { %v410_v12 = vpop.f32.mrf.mxu0 }
  0xeb   : > { %614 = vst.msk [vmem:[%s1891_s3 + $0x60] sm:$0xf] %vm589_vm1, %v581_v11  ;;  %v566_v13 = vpack.c.bf16 %v410_v12, %v410_v12  ;;  %702 = vrot.lane.b32.xlu0 %v581_v11, %s1703_s7  ;;  %670 = vrot.lane.b32.xlu2 %v565_v9, %s1703_s7  ;;  %v494_v12 = vpop.f32.mrf.mxu1 }
  0xec   : > { %1542 = vst.msk [vmem:[%s1891_s3 + $0x158] sm:$0xf] %vm589_vm1, %v805_v10  ;;  %v884_v10 = vld [vmem:[%s1891_s3 + $0x10] sm:$0xff] (%p1765_p5)  }
  0xed   : > { %599 = vst.msk [vmem:[%s1891_s3 + $0x24] sm:$0xf] %vm589_vm1, %v566_v13 }
  0xee   : > { %885 = vst [vmem:[%s2138_s20 + $0x10] sm:$0xff] (%p1765_p5), %v884_v10  }
  0xf0   : > { %v450_v14 = vpop.f32.mrf.mxu2 }
  0xf1   : > { %v582_v15 = vpack.c.bf16 %v450_v14, %v450_v14  ;;  %v534_v14 = vpop.f32.mrf.mxu3 }
  0xf2   : > { %v413_v16 = vpop.f32.mrf.mxu0 }
  0xf3   : > { %615 = vst.msk [vmem:[%s1891_s3 + $0x64] sm:$0xf] %vm589_vm1, %v582_v15  ;;  %v567_v17 = vpack.c.bf16 %v413_v16, %v413_v16  ;;  %704 = vrot.lane.b32.xlu1 %v582_v15, %s1703_s7  ;;  %672 = vrot.lane.b32.xlu0 %v566_v13, %s1703_s7  ;;  %v790_v13 = vpack.c.bf16 %v494_v12, %v494_v12  ;;  %v497_v18 = vpop.f32.mrf.mxu1 }
  0xf4   : > { %v791_v19 = vpack.c.bf16 %v497_v18, %v497_v18  ;;  %v892_v12 = vld [vmem:[%s1891_s3 + $0x20] sm:$0xff] (%p1765_p5)   ;;  %v916_v18 = vld [vmem:[%s1891_s3 + $0x50] sm:$0xff] (%p1765_p5)  }
  0xf5   : > { %600 = vst.msk [vmem:[%s1891_s3 + $0x28] sm:$0xf] %vm589_vm1, %v567_v17 }
  0xf6   : > { %1527 = vst.msk [vmem:[%s1891_s3 + $0x11c] sm:$0xf] %vm589_vm1, %v790_v13 }
  0xf7   : > { %1528 = vst.msk [vmem:[%s1891_s3 + $0x120] sm:$0xf] %vm589_vm1, %v791_v19  ;;  %v920_v19 = vld [vmem:[%s1891_s3 + $0x58] sm:$0xff] (%p1765_p5)  }
  0xf8   : > { %v453_v22 = vpop.f32.mrf.mxu2  ;;  %893 = vst [vmem:[%s2138_s20 + $0x20] sm:$0xff] (%p1765_p5), %v892_v12  }
  0xf9   : > { %v583_v23 = vpack.c.bf16 %v453_v22, %v453_v22  ;;  %v537_v20 = vpop.f32.mrf.mxu3  ;;  %917 = vst [vmem:[%s2138_s20 + $0x50] sm:$0xff] (%p1765_p5), %v916_v18  }
  0xfa   : > { %v415_v24 = vpop.f32.mrf.mxu0  ;;  %v807_v22 = vpack.c.bf16 %v537_v20, %v537_v20  ;;  %v924_v20 = vld [vmem:[%s1891_s3 + $0x60] sm:$0xff] (%p1765_p5)   ;;  %921 = vst [vmem:[%s2138_s20 + $0x58] sm:$0xff] (%p1765_p5), %v920_v19  }
  0xfb   : > { %616 = vst.msk [vmem:[%s1891_s3 + $0x68] sm:$0xf] %vm589_vm1, %v583_v23  ;;  %v568_v25 = vpack.c.bf16 %v415_v24, %v415_v24  ;;  %706 = vrot.lane.b32.xlu2 %v583_v23, %s1703_s7  ;;  %674 = vrot.lane.b32.xlu1 %v567_v17, %s1703_s7  ;;  %v806_v17 = vpack.c.bf16 %v534_v14, %v534_v14  ;;  %v499_v24 = vpop.f32.mrf.mxu1 }
  0xfc   : > { %1544 = vst.msk [vmem:[%s1891_s3 + $0x160] sm:$0xf] %vm589_vm1, %v807_v22 }
  0xfd   : > { %601 = vst.msk [vmem:[%s1891_s3 + $0x2c] sm:$0xf] %vm589_vm1, %v568_v25 }
  0xfe   : > { %1543 = vst.msk [vmem:[%s1891_s3 + $0x15c] sm:$0xf] %vm589_vm1, %v806_v17  ;;  %v912_v17 = vld [vmem:[%s1891_s3 + $0x48] sm:$0xff] (%p1765_p5)  }
  0xff   : > { %913 = vst [vmem:[%s2138_s20 + $0x48] sm:$0xff] (%p1765_p5), %v912_v17  }
 0x100   : > { %v455_v30 = vpop.f32.mrf.mxu2  ;;  %925 = vst [vmem:[%s2138_s20 + $0x60] sm:$0xff] (%p1765_p5), %v924_v20  }
 0x101   : > { %v584_v31 = vpack.c.bf16 %v455_v30, %v455_v30  ;;  %v539_v26 = vpop.f32.mrf.mxu3 }
 0x102   : > { %v418_v32 = vpop.f32.mrf.mxu0  ;;  %v808_v27 = vpack.c.bf16 %v539_v26, %v539_v26 }
 0x103   : > { %617 = vst.msk [vmem:[%s1891_s3 + $0x6c] sm:$0xf] %vm589_vm1, %v584_v31  ;;  %v569_v33 = vpack.c.bf16 %v418_v32, %v418_v32  ;;  %708 = vrot.lane.b32.xlu0 %v584_v31, %s1703_s7  ;;  %676 = vrot.lane.b32.xlu2 %v568_v25, %s1703_s7  ;;  %v792_v25 = vpack.c.bf16 %v499_v24, %v499_v24  ;;  %v502_v30 = vpop.f32.mrf.mxu1 }
 0x104   : > { %1545 = vst.msk [vmem:[%s1891_s3 + $0x164] sm:$0xf] %vm589_vm1, %v808_v27  ;;  %v793_v32 = vpack.c.bf16 %v502_v30, %v502_v30  ;;  %v896_v13 = vld [vmem:[%s1891_s3 + $0x28] sm:$0xff] (%p1765_p5)  }
 0x105   : > { %602 = vst.msk [vmem:[%s1891_s3 + $0x30] sm:$0xf] %vm589_vm1, %v569_v33 }
 0x106   : > { %1529 = vst.msk [vmem:[%s1891_s3 + $0x124] sm:$0xf] %vm589_vm1, %v792_v25 }
 0x107   : > { %1530 = vst.msk [vmem:[%s1891_s3 + $0x128] sm:$0xf] %vm589_vm1, %v793_v32 }
 0x108   : > { %v458_v38 = vpop.f32.mrf.mxu2  ;;  %897 = vst [vmem:[%s2138_s20 + $0x28] sm:$0xff] (%p1765_p5), %v896_v13  }
 0x109   : > { %v585_v39 = vpack.c.bf16 %v458_v38, %v458_v38  ;;  %v542_v31 = vpop.f32.mrf.mxu3 }
 0x10a   : > { %v420_v40 = vpop.f32.mrf.mxu0 }
 0x10b   : > { %618 = vst.msk [vmem:[%s1891_s3 + $0x70] sm:$0xf] %vm589_vm1, %v585_v39  ;;  %v570_v41 = vpack.c.bf16 %v420_v40, %v420_v40  ;;  %710 = vrot.lane.b32.xlu1 %v585_v39, %s1703_s7  ;;  %678 = vrot.lane.b32.xlu0 %v569_v33, %s1703_s7  ;;  %v809_v33 = vpack.c.bf16 %v542_v31, %v542_v31  ;;  %v504_v36 = vpop.f32.mrf.mxu1 }
 0x10c   : > { %v794_v38 = vpack.c.bf16 %v504_v36, %v504_v36 }
 0x10d   : > { %603 = vst.msk [vmem:[%s1891_s3 + $0x34] sm:$0xf] %vm589_vm1, %v570_v41  ;;  %v689_v42 = vpop.permute.xlu2 %688 }
 0x10e   : > { %1505 = vst.msk [vmem:[%s1891_s3 + $0xc4] sm:$0xf] %vm589_vm1, %v689_v42 }
 0x10f   : > { %1546 = vst.msk [vmem:[%s1891_s3 + $0x168] sm:$0xf] %vm589_vm1, %v809_v33 }
 0x110   : > { %v460_v47 = vpop.f32.mrf.mxu2  ;;  %1531 = vst.msk [vmem:[%s1891_s3 + $0x12c] sm:$0xf] %vm589_vm1, %v794_v38 }
 0x111   : > { %v586_v48 = vpack.c.bf16 %v460_v47, %v460_v47  ;;  %v544_v37 = vpop.f32.mrf.mxu3 }
 0x112   : > { %v423_v49 = vpop.f32.mrf.mxu0  ;;  %v810_v39 = vpack.c.bf16 %v544_v37, %v544_v37 }
 0x113   : > { %619 = vst.msk [vmem:[%s1891_s3 + $0x74] sm:$0xf] %vm589_vm1, %v586_v48  ;;  %v571_v50 = vpack.c.bf16 %v423_v49, %v423_v49  ;;  %680 = vrot.lane.b32.xlu1 %v570_v41, %s1703_s7  ;;  %v507_v42 = vpop.f32.mrf.mxu1 }
 0x114   : > { %1547 = vst.msk [vmem:[%s1891_s3 + $0x16c] sm:$0xf] %vm589_vm1, %v810_v39  ;;  %v795_v44 = vpack.c.bf16 %v507_v42, %v507_v42  ;;  %v900_v14 = vld [vmem:[%s1891_s3 + $0x30] sm:$0xff] (%p1765_p5)  }
 0x115   : > { %604 = vst.msk [vmem:[%s1891_s3 + $0x38] sm:$0xf] %vm589_vm1, %v571_v50  ;;  %682 = vrot.lane.b32.xlu2 %v571_v50, %s1703_s7  ;;  %v1012_v42 = vld [vmem:[%s1891_s3 + $0x110] sm:$0xff] (%p1765_p5)  }
 0x116   : > { %1532 = vst.msk [vmem:[%s1891_s3 + $0x130] sm:$0xf] %vm589_vm1, %v795_v44  ;;  %v1020_v44 = vld [vmem:[%s1891_s3 + $0x120] sm:$0xff] (%p1765_p5)  }
 0x117   : > { %v655_v54 = vpop.permute.xlu0 %654  ;;  %901 = vst [vmem:[%s2138_s20 + $0x30] sm:$0xff] (%p1765_p5), %v900_v14  }
 0x118   : > { %1488 = vst.msk [vmem:[%s1891_s3 + $0x80] sm:$0xf] %vm589_vm1, %v655_v54  ;;  %v463_v56 = vpop.f32.mrf.mxu2 }
 0x119   : > { %v587_v57 = vpack.c.bf16 %v463_v56, %v463_v56  ;;  %v547_v43 = vpop.f32.mrf.mxu3  ;;  %1013 = vst [vmem:[%s2138_s20 + $0x410] sm:$0xff] (%p1765_p5), %v1012_v42  }
 0x11a   : > { %v425_v58 = vpop.f32.mrf.mxu0  ;;  %v811_v45 = vpack.c.bf16 %v547_v43, %v547_v43  ;;  %v932_v22 = vld [vmem:[%s1891_s3 + $0x70] sm:$0xff] (%p1765_p5)   ;;  %v1016_v43 = vld [vmem:[%s1891_s3 + $0x118] sm:$0xff] (%p1765_p5)   ;;  %1021 = vst [vmem:[%s2138_s20 + $0x420] sm:$0xff] (%p1765_p5), %v1020_v44  }
 0x11b   : > { %620 = vst.msk [vmem:[%s1891_s3 + $0x78] sm:$0xf] %vm589_vm1, %v587_v57  ;;  %v572_v59 = vpack.c.bf16 %v425_v58, %v425_v58 }
 0x11c   : > { %1548 = vst.msk [vmem:[%s1891_s3 + $0x170] sm:$0xf] %vm589_vm1, %v811_v45  ;;  %v1024_v45 = vld [vmem:[%s1891_s3 + $0x128] sm:$0xff] (%p1765_p5)  }
 0x11d   : > { %605 = vst.msk [vmem:[%s1891_s3 + $0x3c] sm:$0xf] %vm589_vm1, %v572_v59  ;;  %712 = vrot.lane.b32.xlu2 %v586_v48, %s1703_s7  ;;  %684 = vrot.lane.b32.xlu0 %v572_v59, %s1703_s7  ;;  %v687_v60 = vpop.permute.xlu1 %686  ;;  %v509_v48 = vpop.f32.mrf.mxu1 }
 0x11e   : > { %1504 = vst.msk [vmem:[%s1891_s3 + $0xc0] sm:$0xf] %vm589_vm1, %v687_v60  ;;  %v796_v50 = vpack.c.bf16 %v509_v48, %v509_v48  ;;  %v1036_v48 = vld [vmem:[%s1891_s3 + $0x140] sm:$0xff] (%p1765_p5)  }
 0x11f   : > { %v657_v0 = vpop.permute.xlu0 %656  ;;  %v663_v1 = vpop.permute.xlu2 %662  ;;  %933 = vst [vmem:[%s2138_s20 + $0x70] sm:$0xff] (%p1765_p5), %v932_v22  }
 0x120   : > { %1489 = vst.msk [vmem:[%s1891_s3 + $0x84] sm:$0xf] %vm589_vm1, %v657_v0  ;;  %v465_v2 = vpop.f32.mrf.mxu2 }
 0x121   : > { %1492 = vst.msk [vmem:[%s1891_s3 + $0x90] sm:$0xf] %vm589_vm1, %v663_v1  ;;  %v588_v4 = vpack.c.bf16 %v465_v2, %v465_v2  ;;  %v549_v49 = vpop.f32.mrf.mxu3 }
 0x122   : > { %v812_v51 = vpack.c.bf16 %v549_v49, %v549_v49  ;;  %1533 = vst.msk [vmem:[%s1891_s3 + $0x134] sm:$0xf] %vm589_vm1, %v796_v50  ;;  %v1040_v49 = vld [vmem:[%s1891_s3 + $0x148] sm:$0xff] (%p1765_p5)   ;;  %v1044_v50 = vld [vmem:[%s1891_s3 + $0x150] sm:$0xff] (%p1765_p5)  }
 0x123   : > { %621 = vst.msk [vmem:[%s1891_s3 + $0x7c] sm:$0xf] %vm589_vm1, %v588_v4  ;;  %716 = vrot.lane.b32.xlu1 %v588_v4, %s1703_s7 }
 0x124   : > { %1549 = vst.msk [vmem:[%s1891_s3 + $0x174] sm:$0xf] %vm589_vm1, %v812_v51  ;;  %v1048_v51 = vld [vmem:[%s1891_s3 + $0x158] sm:$0xff] (%p1765_p5)  }
 0x125   : > { %714 = vrot.lane.b32.xlu0 %v587_v57, %s1703_s7  ;;  %v512_v54 = vpop.f32.mrf.mxu1  ;;  %v972_v32 = vld [vmem:[%s1891_s3 + $0xc0] sm:$0xff] (%p1765_p5)   ;;  %1017 = vst [vmem:[%s2138_s20 + $0x418] sm:$0xff] (%p1765_p5), %v1016_v43  }
 0x126   : > { %v797_v56 = vpack.c.bf16 %v512_v54, %v512_v54  ;;  %973 = vst [vmem:[%s2138_s20 + $0x240] sm:$0xff] (%p1765_p5), %v972_v32  }
 0x127   : > { %v659_v8 = vpop.permute.xlu1 %658  ;;  %v695_v9 = vpop.permute.xlu2 %694  ;;  %v940_v24 = vld [vmem:[%s1891_s3 + $0x80] sm:$0xff] (%p1765_p5)   ;;  %1025 = vst [vmem:[%s2138_s20 + $0x428] sm:$0xff] (%p1765_p5), %v1024_v45  }
 0x128   : > { %1490 = vst.msk [vmem:[%s1891_s3 + $0x88] sm:$0xf] %vm589_vm1, %v659_v8  ;;  %v876_v8 = vld [vmem:[%s1891_s3] sm:$0xff] (%p1765_p5)  }
 0x129   : > { %1508 = vst.msk [vmem:[%s1891_s3 + $0xd0] sm:$0xf] %vm589_vm1, %v695_v9  ;;  %v552_v55 = vpop.f32.mrf.mxu3  ;;  %v880_v9 = vld [vmem:[%s1891_s3 + $0x8] sm:$0xff] (%p1765_p5)  }
 0x12a   : > { %v813_v57 = vpack.c.bf16 %v552_v55, %v552_v55  ;;  %1534 = vst.msk [vmem:[%s1891_s3 + $0x138] sm:$0xf] %vm589_vm1, %v797_v56 }
 0x12b   : > { %877 = vst [vmem:[%s2138_s20] sm:$0xff] (%p1765_p5), %v876_v8   ;;  %v1060_v54 = vld [vmem:[%s1891_s3 + $0x170] sm:$0xff] (%p1765_p5)  }
 0x12c   : > { %1550 = vst.msk [vmem:[%s1891_s3 + $0x178] sm:$0xf] %vm589_vm1, %v813_v57 }
 0x12d   : > { %v691_v11 = vpop.permute.xlu0 %690  ;;  %v514_v59 = vpop.f32.mrf.mxu1  ;;  %881 = vst [vmem:[%s2138_s20 + $0x8] sm:$0xff] (%p1765_p5), %v880_v9  }
 0x12e   : > { %1506 = vst.msk [vmem:[%s1891_s3 + $0xc8] sm:$0xf] %vm589_vm1, %v691_v11  ;;  %v798_v62 = vpack.c.bf16 %v514_v59, %v514_v59  ;;  %v888_v11 = vld [vmem:[%s1891_s3 + $0x18] sm:$0xff] (%p1765_p5)  }
 0x12f   : > { %v661_v15 = vpop.permute.xlu1 %660  ;;  %v665_v16 = vpop.permute.xlu2 %664  ;;  %889 = vst [vmem:[%s2138_s20 + $0x18] sm:$0xff] (%p1765_p5), %v888_v11  }
 0x130   : > { %1491 = vst.msk [vmem:[%s1891_s3 + $0x8c] sm:$0xf] %vm589_vm1, %v661_v15  ;;  %v904_v15 = vld [vmem:[%s1891_s3 + $0x38] sm:$0xff] (%p1765_p5)  }
 0x131   : > { %1493 = vst.msk [vmem:[%s1891_s3 + $0x94] sm:$0xf] %vm589_vm1, %v665_v16  ;;  %v554_v60 = vpop.f32.mrf.mxu3  ;;  %v908_v16 = vld [vmem:[%s1891_s3 + $0x40] sm:$0xff] (%p1765_p5)  }
 0x132   : > { %v814_v63 = vpack.c.bf16 %v554_v60, %v554_v60  ;;  %1535 = vst.msk [vmem:[%s1891_s3 + $0x13c] sm:$0xf] %vm589_vm1, %v798_v62 }
 0x133   : > { %905 = vst [vmem:[%s2138_s20 + $0x38] sm:$0xff] (%p1765_p5), %v904_v15  }
 0x134   : > { %1551 = vst.msk [vmem:[%s1891_s3 + $0x17c] sm:$0xf] %vm589_vm1, %v814_v63 }
 0x135   : > { %909 = vst [vmem:[%s2138_s20 + $0x40] sm:$0xff] (%p1765_p5), %v908_v16  }
 0x136   : > { %941 = vst [vmem:[%s2138_s20 + $0x200] sm:$0xff] (%p1765_p5), %v940_v24  }
 0x137   : > { %v693_v21 = vpop.permute.xlu1 %692  ;;  %v944_v25 = vld [vmem:[%s1891_s3 + $0x88] sm:$0xff] (%p1765_p5)   ;;  %1037 = vst [vmem:[%s2138_s20 + $0x440] sm:$0xff] (%p1765_p5), %v1036_v48  }
 0x138   : > { %1507 = vst.msk [vmem:[%s1891_s3 + $0xcc] sm:$0xf] %vm589_vm1, %v693_v21  ;;  %v928_v21 = vld [vmem:[%s1891_s3 + $0x68] sm:$0xff] (%p1765_p5)   ;;  %v948_v26 = vld [vmem:[%s1891_s3 + $0x90] sm:$0xff] (%p1765_p5)  }
 0x139   : > { %929 = vst [vmem:[%s2138_s20 + $0x68] sm:$0xff] (%p1765_p5), %v928_v21  }
 0x13a   : > { %945 = vst [vmem:[%s2138_s20 + $0x208] sm:$0xff] (%p1765_p5), %v944_v25  }
 0x13b   : > { %949 = vst [vmem:[%s2138_s20 + $0x210] sm:$0xff] (%p1765_p5), %v948_v26   ;;  %v1064_v55 = vld [vmem:[%s1891_s3 + $0x178] sm:$0xff] (%p1765_p5)  }
 0x13c   : > { %1041 = vst [vmem:[%s2138_s20 + $0x448] sm:$0xff] (%p1765_p5), %v1040_v49  }
 0x13d   : > { %v701_v23 = vpop.permute.xlu2 %700  ;;  %1045 = vst [vmem:[%s2138_s20 + $0x450] sm:$0xff] (%p1765_p5), %v1044_v50  }
 0x13e   : > { %1511 = vst.msk [vmem:[%s1891_s3 + $0xdc] sm:$0xf] %vm589_vm1, %v701_v23  ;;  %v936_v23 = vld [vmem:[%s1891_s3 + $0x78] sm:$0xff] (%p1765_p5)  }
 0x13f   : > { %937 = vst [vmem:[%s2138_s20 + $0x78] sm:$0xff] (%p1765_p5), %v936_v23   ;;  %v976_v33 = vld [vmem:[%s1891_s3 + $0xc8] sm:$0xff] (%p1765_p5)  }
 0x140   : > { %977 = vst [vmem:[%s2138_s20 + $0x248] sm:$0xff] (%p1765_p5), %v976_v33  }
 0x141   : > { %1049 = vst [vmem:[%s2138_s20 + $0x458] sm:$0xff] (%p1765_p5), %v1048_v51  }
 0x142   : > { %1061 = vst [vmem:[%s2138_s20 + $0x470] sm:$0xff] (%p1765_p5), %v1060_v54  }
 0x143   : > { %1065 = vst [vmem:[%s2138_s20 + $0x478] sm:$0xff] (%p1765_p5), %v1064_v55  }
 0x145   : > { %v697_v28 = vpop.permute.xlu0 %696  ;;  %v671_v29 = vpop.permute.xlu2 %670 }
 0x146   : > { %1509 = vst.msk [vmem:[%s1891_s3 + $0xd4] sm:$0xf] %vm589_vm1, %v697_v28 }
 0x147   : > { %1496 = vst.msk [vmem:[%s1891_s3 + $0xa0] sm:$0xf] %vm589_vm1, %v671_v29 }
 0x14d   : > { %v699_v34 = vpop.permute.xlu1 %698  ;;  %v667_v35 = vpop.permute.xlu0 %666 }
 0x14e   : > { %1510 = vst.msk [vmem:[%s1891_s3 + $0xd8] sm:$0xf] %vm589_vm1, %v699_v34  ;;  %v980_v34 = vld [vmem:[%s1891_s3 + $0xd0] sm:$0xff] (%p1765_p5)  }
 0x14f   : > { %1494 = vst.msk [vmem:[%s1891_s3 + $0x98] sm:$0xf] %vm589_vm1, %v667_v35 }
 0x150   : > { %981 = vst [vmem:[%s2138_s20 + $0x250] sm:$0xff] (%p1765_p5), %v980_v34  }
 0x155   : > { %v669_v40 = vpop.permute.xlu1 %668  ;;  %v707_v41 = vpop.permute.xlu2 %706  ;;  %v984_v35 = vld [vmem:[%s1891_s3 + $0xd8] sm:$0xff] (%p1765_p5)  }
 0x156   : > { %1495 = vst.msk [vmem:[%s1891_s3 + $0x9c] sm:$0xf] %vm589_vm1, %v669_v40  ;;  %v1004_v40 = vld [vmem:[%s1891_s3 + $0x100] sm:$0xff] (%p1765_p5)  }
 0x157   : > { %1514 = vst.msk [vmem:[%s1891_s3 + $0xe8] sm:$0xf] %vm589_vm1, %v707_v41  ;;  %v1008_v41 = vld [vmem:[%s1891_s3 + $0x108] sm:$0xff] (%p1765_p5)  }
 0x158   : > { %985 = vst [vmem:[%s2138_s20 + $0x258] sm:$0xff] (%p1765_p5), %v984_v35  }
 0x159   : > { %1005 = vst [vmem:[%s2138_s20 + $0x400] sm:$0xff] (%p1765_p5), %v1004_v40  }
 0x15a   : > { %1009 = vst [vmem:[%s2138_s20 + $0x408] sm:$0xff] (%p1765_p5), %v1008_v41  }
 0x15d   : > { %v703_v46 = vpop.permute.xlu0 %702  ;;  %v677_v47 = vpop.permute.xlu2 %676  ;;  %v952_v27 = vld [vmem:[%s1891_s3 + $0x98] sm:$0xff] (%p1765_p5)  }
 0x15e   : > { %1512 = vst.msk [vmem:[%s1891_s3 + $0xe0] sm:$0xf] %vm589_vm1, %v703_v46  ;;  %v1028_v46 = vld [vmem:[%s1891_s3 + $0x130] sm:$0xff] (%p1765_p5)  }
 0x15f   : > { %1499 = vst.msk [vmem:[%s1891_s3 + $0xac] sm:$0xf] %vm589_vm1, %v677_v47  ;;  %v1032_v47 = vld [vmem:[%s1891_s3 + $0x138] sm:$0xff] (%p1765_p5)  }
 0x160   : > { %953 = vst [vmem:[%s2138_s20 + $0x218] sm:$0xff] (%p1765_p5), %v952_v27  }
 0x161   : > { %1029 = vst [vmem:[%s2138_s20 + $0x430] sm:$0xff] (%p1765_p5), %v1028_v46  }
 0x162   : > { %1033 = vst [vmem:[%s2138_s20 + $0x438] sm:$0xff] (%p1765_p5), %v1032_v47  }
 0x165   : > { %v705_v52 = vpop.permute.xlu1 %704  ;;  %v673_v53 = vpop.permute.xlu0 %672 }
 0x166   : > { %1513 = vst.msk [vmem:[%s1891_s3 + $0xe4] sm:$0xf] %vm589_vm1, %v705_v52  ;;  %v1052_v52 = vld [vmem:[%s1891_s3 + $0x160] sm:$0xff] (%p1765_p5)  }
 0x167   : > { %1497 = vst.msk [vmem:[%s1891_s3 + $0xa4] sm:$0xf] %vm589_vm1, %v673_v53  ;;  %v1056_v53 = vld [vmem:[%s1891_s3 + $0x168] sm:$0xff] (%p1765_p5)  }
 0x168   : > { %1053 = vst [vmem:[%s2138_s20 + $0x460] sm:$0xff] (%p1765_p5), %v1052_v52  }
 0x169   : > { %1057 = vst [vmem:[%s2138_s20 + $0x468] sm:$0xff] (%p1765_p5), %v1056_v53  }
 0x16d   : > { %v675_v58 = vpop.permute.xlu1 %674  ;;  %v988_v36 = vld [vmem:[%s1891_s3 + $0xe0] sm:$0xff] (%p1765_p5)  }
 0x16e   : > { %1498 = vst.msk [vmem:[%s1891_s3 + $0xa8] sm:$0xf] %vm589_vm1, %v675_v58  ;;  %v956_v28 = vld [vmem:[%s1891_s3 + $0xa0] sm:$0xff] (%p1765_p5)  }
 0x16f   : > { %v683_v61 = vpop.permute.xlu2 %682  ;;  %957 = vst [vmem:[%s2138_s20 + $0x220] sm:$0xff] (%p1765_p5), %v956_v28  }
 0x170   : > { %1502 = vst.msk [vmem:[%s1891_s3 + $0xb8] sm:$0xf] %vm589_vm1, %v683_v61 }
 0x171   : > { %989 = vst [vmem:[%s2138_s20 + $0x260] sm:$0xff] (%p1765_p5), %v988_v36  }
 0x175   : > { %v709_v0 = vpop.permute.xlu0 %708  ;;  %v960_v29 = vld [vmem:[%s1891_s3 + $0xa8] sm:$0xff] (%p1765_p5)  }
 0x176   : > { %1515 = vst.msk [vmem:[%s1891_s3 + $0xec] sm:$0xf] %vm589_vm1, %v709_v0 }
 0x177   : > { %v713_v1 = vpop.permute.xlu2 %712  ;;  %961 = vst [vmem:[%s2138_s20 + $0x228] sm:$0xff] (%p1765_p5), %v960_v29  }
 0x178   : > { %1517 = vst.msk [vmem:[%s1891_s3 + $0xf4] sm:$0xf] %vm589_vm1, %v713_v1 }
 0x17d   : > { %v711_v2 = vpop.permute.xlu1 %710  ;;  %v679_v3 = vpop.permute.xlu0 %678  ;;  %v992_v37 = vld [vmem:[%s1891_s3 + $0xe8] sm:$0xff] (%p1765_p5)  }
 0x17e   : > { %1516 = vst.msk [vmem:[%s1891_s3 + $0xf0] sm:$0xf] %vm589_vm1, %v711_v2 }
 0x17f   : > { %1500 = vst.msk [vmem:[%s1891_s3 + $0xb0] sm:$0xf] %vm589_vm1, %v679_v3 }
 0x180   : > { %993 = vst [vmem:[%s2138_s20 + $0x268] sm:$0xff] (%p1765_p5), %v992_v37  }
 0x185   : > { %v681_v4 = vpop.permute.xlu1 %680  ;;  %v996_v38 = vld [vmem:[%s1891_s3 + $0xf0] sm:$0xff] (%p1765_p5)  }
 0x186   : > { %1501 = vst.msk [vmem:[%s1891_s3 + $0xb4] sm:$0xf] %vm589_vm1, %v681_v4 }
 0x187   : > { %997 = vst [vmem:[%s2138_s20 + $0x270] sm:$0xff] (%p1765_p5), %v996_v38  }
 0x18d   : > { %v964_v30 = vld [vmem:[%s1891_s3 + $0xb0] sm:$0xff] (%p1765_p5)  }
 0x18e   : > { %965 = vst [vmem:[%s2138_s20 + $0x230] sm:$0xff] (%p1765_p5), %v964_v30  }
 0x18f   : > { %v685_v5 = vpop.permute.xlu0 %684 }
 0x190   : > { %1503 = vst.msk [vmem:[%s1891_s3 + $0xbc] sm:$0xf] %vm589_vm1, %v685_v5 }
 0x194   : > { %854 = sbr.rel (!%p1765_p5) target bundleno = 417 (0x1a1), region = 32 }
 0x195   : > { %v717_v6 = vpop.permute.xlu1 %716 }
 0x196   : > { %1519 = vst.msk [vmem:[%s1891_s3 + $0xfc] sm:$0xf] %vm589_vm1, %v717_v6 }
 0x197   : > { %v715_v7 = vpop.permute.xlu0 %714  ;;  %v968_v31 = vld [vmem:[%s1891_s3 + $0xb8] sm:$0xff] (%p1765_p5)  }
 0x198   : > { %1518 = vst.msk [vmem:[%s1891_s3 + $0xf8] sm:$0xf] %vm589_vm1, %v715_v7 }
 0x199   : > { %969 = vst [vmem:[%s2138_s20 + $0x238] sm:$0xff] %v968_v31  }
 0x19f   : > { %v1000_v39 = vld [vmem:[%s1891_s3 + $0xf8] sm:$0xff]  }
 0x1a0   : > { %1001 = vst [vmem:[%s2138_s20 + $0x278] sm:$0xff] %v1000_v39  }
 0x1a1 PF: > { %s12_s15 = sadd.s32 1, %s1701_s15   ;;  %s2259_s9 = smov %s1681_s10 }
 0x1a2   : > { %p9_p11 = scmp.ge.s32.totalorder %s12_s15, 6   ;;  %s2260_s10 = smov %s1776_s24 }
 0x1a3   : > { %s2261_s11 = smov %s1693_s13  ;;  %s2262_s12 = smov %s1697_s14 }
 0x1a4   : > { %s2263_s13 = smov %s2266_s16  ;;  %s2264_s14 = smov %s2270_s17 }
 0x1a5   :  { %11 = sbr.rel (!%p9_p11) target bundleno = 4 (0x4), region = 101 }

</bundles_post_ra>
